<compile_context>
chip_gen: v5e
topology: v5e:2x2
jax: 0.10.0
libtpu: 0.0.40
codegen_flags: <defaults>
</compile_context>

<pallas_src>
import functools

import jax
import jax.numpy as jnp
from jax.experimental import pallas as pl
from jax.experimental.pallas import tpu as pltpu

# --- "config" constants (stand-ins for config.MODEL / config.LOSS) -----------
IGNORE_INDEX = -1
NUM_OUTPUTS = 2
BALANCE_WEIGHTS = (1.0, 0.4)
AUX_WEIGHTS = 1.0

_LANE = 128
_CHUNK_TARGET = 2048            # lanes per in-kernel compute chunk (default)


# ------------------------------- kernel --------------------------------------
def _fused_ce_kernel(*refs, balance_weights, hw, tile_p, chunk, tiles_per_split):
    """One grid step = (pixel-range split, batch element, pixel tile).

    refs = (target_ref, wclass_ref, *logits_refs, num_ref, den_ref, acc_ref)
      target_ref : (1, TILE_P) int32        (batch dim squeezed)
      wclass_ref : (C, 1)      f32
      logits_ref : (C, TILE_P) per head     (batch dim squeezed, native NCHW)
      num_ref    : (1, 1) f32 per-(split, batch) partial numerator
      den_ref    : (1, 1) f32 per-(split, batch) partial denominator
      acc_ref    : (2, CHUNK) f32 merged VMEM accumulator (row0=num, row1=den)
    """
    k = len(balance_weights)
    target_ref, wclass_ref = refs[0], refs[1]
    logits_refs = refs[2:2 + k]
    num_ref, den_ref = refs[2 + k], refs[3 + k]
    acc_ref = refs[4 + k]

    s_idx = pl.program_id(0)
    p_idx = pl.program_id(2)
    g_tile = s_idx * tiles_per_split + p_idx     # logical global pixel-tile index

    @pl.when(p_idx == 0)
    def _():
        acc_ref[...] = jnp.zeros_like(acc_ref)

    wcls = wclass_ref[...].astype(jnp.float32)   # (C, 1)
    c = wcls.shape[0]
    n_chunks = tile_p // chunk

    def chunk_body(off):
        t = target_ref[:, pl.ds(off, chunk)]     # (1, chunk) int32

        # ragged-tail / dummy-split-tile mask, folded with ignore_index
        lane = jax.lax.broadcasted_iota(jnp.int32, (1, chunk), 1)
        pix = g_tile * tile_p + off + lane
        mask_valid = jnp.logical_and(pix < hw, t != IGNORE_INDEX)

        # one-hot over classes (sublane axis); shared by gather of x[t] and w[t]
        cls = jax.lax.broadcasted_iota(jnp.int32, (c, chunk), 0)
        onehot = cls == t
        w_t = jnp.sum(jnp.where(onehot, wcls, 0.0), axis=0, keepdims=True)

        # balance-weighted NLL, accumulated over heads (math kept in f32;
        # bf16 logits are upcast per-chunk here, not in the wrapper)
        nll_w = jnp.zeros((1, chunk), jnp.float32)
        for bw, lref in zip(balance_weights, logits_refs):
            x = lref[:, pl.ds(off, chunk)].astype(jnp.float32)   # (C, chunk)
            m = jnp.max(x, axis=0, keepdims=True)
            lse = m + jnp.log(jnp.sum(jnp.exp(x - m), axis=0, keepdims=True))
            x_t = jnp.sum(jnp.where(onehot, x, 0.0), axis=0, keepdims=True)
            nll_w = nll_w + bw * (lse - x_t)

        # where-mask (not multiply) so garbage in masked lanes can't propagate
        acc_ref[0:1, :] = acc_ref[0:1, :] + jnp.where(mask_valid, nll_w * w_t, 0.0)
        acc_ref[1:2, :] = acc_ref[1:2, :] + jnp.where(mask_valid, w_t, 0.0)

    if n_chunks == 1:
        chunk_body(0)
    else:
        @pl.loop(0, n_chunks)
        def _(ci):
            chunk_body(pl.multiple_of(ci * chunk, chunk))

    @pl.when(p_idx == pl.num_programs(2) - 1)
    def _():
        num_ref[...] = jnp.sum(acc_ref[0:1, :], axis=1, keepdims=True)
        den_ref[...] = jnp.sum(acc_ref[1:2, :], axis=1, keepdims=True)


# ------------------------------- sizing --------------------------------------
def _vmem_budget_and_limit():
    """Per-generation VMEM sizing: ~45% of physical VMEM for pipelined buffers,
    ~75% as the Mosaic scoped-VMEM limit (v5e/v6e: 128 MiB; v7x: 64 MiB)."""
    cap = 64 * 1024 * 1024                      # conservative (v7x-sized) fallback
    try:
        cap = int(pltpu.get_tpu_info().vmem_capacity_bytes)
    except Exception:
        pass
    return int(cap * 0.45), int(cap * 0.75)


def _choose_tiling(hw, c, k, dtype, vmem_budget_bytes, max_tile_pixels, chunk_target):
    """Largest lane-multiple pixel tile whose *padded* double-buffered inputs
    plus fixed per-chunk temporaries fit the VMEM budget."""
    itemsize = jnp.dtype(dtype).itemsize
    pack = max(8, 32 // itemsize)               # sublane packing (f32:8, bf16:16, i8:32)
    c_pad = pl.cdiv(c, pack) * pack
    # double-buffered bytes/pixel (padded shapes):
    #   logits : 2 buffers * k heads * C_pad sublanes * itemsize
    #   target : 2 buffers * 8 sublanes (1 -> 8 pad) * 4 B
    bytes_per_pixel = 2 * k * c_pad * itemsize + 2 * 8 * 4
    # fixed (tile-size independent): (2->8, chunk) f32 accumulator plus roughly
    # 6 (C_pad, chunk) f32 temporaries for the per-chunk elementwise chain.
    fixed = 8 * chunk_target * 4 + 6 * c_pad * chunk_target * 4
    cap = max(_LANE,
              (max(vmem_budget_bytes - fixed, 0) // bytes_per_pixel) // _LANE * _LANE)
    hw_rounded = pl.cdiv(hw, _LANE) * _LANE
    tile = int(min(max_tile_pixels, cap, hw_rounded))
    if tile > chunk_target:
        tile = tile // chunk_target * chunk_target
        chunk = chunk_target
    else:
        chunk = tile
    return tile, chunk


# ------------------------------- wrapper --------------------------------------
def _fused_cross_entropy(predictions, target_nhw, class_weight, head_weights,
                         max_tile_pixels=256 * 1024, chunk_target=_CHUNK_TARGET):
    """Weighted sum of per-head mean cross entropies, computed in one kernel."""
    k = len(predictions)
    n, c, h, w = predictions[0].shape
    hw = h * w

    # Free metadata reshapes only -- no transpose, no pad, no upcast in HBM.
    preds = [p.reshape(n, c, hw) for p in predictions]
    t = target_nhw.reshape(n, 1, hw).astype(jnp.int32)
    wc = class_weight.reshape(c, 1).astype(jnp.float32)

    vmem_budget, vmem_limit = _vmem_budget_and_limit()
    tile_p, chunk = _choose_tiling(hw, c, k, predictions[0].dtype,
                                   vmem_budget, max_tile_pixels, chunk_target)
    num_p_tiles = pl.cdiv(hw, tile_p)

    # v7x megacore coverage when the batch axis alone can't balance two cores;
    # no-op (and no extra work) on single-TC v5e/v6e and for even batch sizes.
    n_splits = 2 if (n % 2 == 1 and num_p_tiles >= 2) else 1
    tiles_per_split = pl.cdiv(num_p_tiles, n_splits)
    grid = (n_splits, n, tiles_per_split)
    last_tile = num_p_tiles - 1

    def _pix_block(si, pi):
        # Clamp out-of-range split tiles to a valid block; the kernel masks
        # them by logical pixel index so they contribute exactly zero.
        return jnp.minimum(si * tiles_per_split + pi, last_tile)

    kernel = functools.partial(
        _fused_ce_kernel,
        balance_weights=tuple(float(b) for b in head_weights),
        hw=hw, tile_p=tile_p, chunk=chunk, tiles_per_split=tiles_per_split,
    )

    in_specs = [
        pl.BlockSpec((None, 1, tile_p),                              # target
                     lambda si, ni, pi: (ni, 0, _pix_block(si, pi))),
        pl.BlockSpec((c, 1), lambda si, ni, pi: (0, 0)),             # class weights
    ] + [
        pl.BlockSpec((None, c, tile_p),                              # each head
                     lambda si, ni, pi: (ni, 0, _pix_block(si, pi)))
        for _ in range(k)
    ]

    out_specs = [
        pl.BlockSpec((None, None, 1, 1), lambda si, ni, pi: (si, ni, 0, 0)),
        pl.BlockSpec((None, None, 1, 1), lambda si, ni, pi: (si, ni, 0, 0)),
    ]

    num, den = pl.pallas_call(
        kernel,
        out_shape=(
            jax.ShapeDtypeStruct((n_splits, n, 1, 1), jnp.float32),
            jax.ShapeDtypeStruct((n_splits, n, 1, 1), jnp.float32),
        ),
        grid_spec=pltpu.PrefetchScalarGridSpec(
            num_scalar_prefetch=0,
            grid=grid,
            in_specs=in_specs,
            out_specs=out_specs,
            scratch_shapes=[pltpu.VMEM((2, chunk), jnp.float32)],
        ),
        compiler_params=pltpu.CompilerParams(
            dimension_semantics=("parallel", "parallel", "arbitrary"),
            vmem_limit_bytes=vmem_limit,
        ),
    )(t, wc, *preds)

    # Shared denominator across heads => weighted numerators / common weight sum.
    # TODO(synk): den == 0 (every pixel ignore_index) yields NaN, same as PyTorch.
    return jnp.sum(num) / jnp.sum(den)


def cross_entropy_loss_forward(predictions, target, class_weight,
                               max_tile_pixels=256 * 1024,
                               chunk_target=_CHUNK_TARGET):
    """Mirrors CrossEntropyLoss.forward from the PyTorch module."""
    if NUM_OUTPUTS == 1 and not isinstance(predictions, (list, tuple)):
        predictions = [predictions]
    if len(BALANCE_WEIGHTS) == len(predictions):
        return _fused_cross_entropy(predictions, target, class_weight,
                                    BALANCE_WEIGHTS, max_tile_pixels, chunk_target)
    elif len(predictions) == 1:
        return _fused_cross_entropy(predictions, target, class_weight,
                                    (AUX_WEIGHTS,), max_tile_pixels, chunk_target)
    else:
        raise ValueError("Mismatch between number of predictions and balance weights.")


# ------------------------------ reference -------------------------------------
def _reference_ce(logits_nchw, target_nhw, class_weight):
    n, c, h, w = logits_nchw.shape
    x = jnp.transpose(logits_nchw, (0, 2, 3, 1)).reshape(-1, c).astype(jnp.float32)
    t = target_nhw.reshape(-1).astype(jnp.int32)
    valid = t != IGNORE_INDEX
    t_safe = jnp.where(valid, t, 0)
    logz = jax.scipy.special.logsumexp(x, axis=-1)
    x_t = jnp.take_along_axis(x, t_safe[:, None], axis=-1)[:, 0]
    w_t = class_weight[t_safe] * valid.astype(jnp.float32)
    num = jnp.sum(w_t * (logz - x_t))
    den = jnp.sum(w_t)
    return num / den


def _reference_forward(predictions, target, class_weight):
    return sum(
        bw * _reference_ce(p, target, class_weight)
        for bw, p in zip(BALANCE_WEIGHTS, predictions)
    )


# -------------------------------- main ----------------------------------------
if __name__ == "__main__":
    key = jax.random.PRNGKey(0)

    # --- Test 1: two heads, even batch, single pixel tile ----------------------
    N, C, H, W = 2, 5, 16, 16            # P = H*W = 256 pixels per image
    k1, k2, k3 = jax.random.split(key, 3)
    pred_main = jax.random.normal(k1, (N, C, H, W), dtype=jnp.float32)
    pred_aux = jax.random.normal(k2, (N, C, H, W), dtype=jnp.float32)
    # targets in [-1, C): includes ignore_index pixels
    target = jax.random.randint(k3, (N, H, W), minval=-1, maxval=C, dtype=jnp.int32)
    class_weight = jnp.linspace(0.5, 1.5, C, dtype=jnp.float32)
    predictions = [pred_main, pred_aux]

    loss = jax.block_until_ready(
        cross_entropy_loss_forward(predictions, target, class_weight))
    ref = jax.block_until_ready(_reference_forward(predictions, target, class_weight))
    assert jnp.allclose(loss, ref, rtol=1e-4, atol=1e-5), (loss, ref)

    # --- Test 2: single head (aux path), odd batch, ragged tail + split axis ---
    N2, C2, H2, W2 = 1, 4, 16, 20        # hw = 320 (not a multiple of 128)
    k4, k5 = jax.random.split(k3)
    pred2 = jax.random.normal(k4, (N2, C2, H2, W2), dtype=jnp.float32)
    target2 = jax.random.randint(k5, (N2, H2, W2), minval=-1, maxval=C2,
                                 dtype=jnp.int32)
    class_weight2 = jnp.linspace(0.8, 1.2, C2, dtype=jnp.float32)

    loss2 = jax.block_until_ready(
        cross_entropy_loss_forward([pred2], target2, class_weight2,
                                   max_tile_pixels=128))
    ref2 = jax.block_until_ready(
        AUX_WEIGHTS * _reference_ce(pred2, target2, class_weight2))
    assert jnp.allclose(loss2, ref2, rtol=1e-4, atol=1e-5), (loss2, ref2)

    # --- Test 3: exercise the in-kernel chunk loop (tile > chunk) --------------
    loss3 = jax.block_until_ready(
        cross_entropy_loss_forward(predictions, target, class_weight,
                                   max_tile_pixels=256, chunk_target=128))
    assert jnp.allclose(loss3, ref, rtol=1e-4, atol=1e-5), (loss3, ref)

    print("KERNEL_OK")
</pallas_src>

<mosaic_0001>
module attributes {stable_mosaic.version = 11 : i64} {
  func.func @_fused_ce_kernel(%arg0: i32, %arg1: i32, %arg2: i32, %arg3: memref<1x1x256xi32, #tpu.memory_space<vmem>>, %arg4: memref<5x1xf32, #tpu.memory_space<vmem>>, %arg5: memref<1x5x256xf32, #tpu.memory_space<vmem>>, %arg6: memref<1x5x256xf32, #tpu.memory_space<vmem>>, %arg7: memref<1x1x1x1xf32, #tpu.memory_space<vmem>>, %arg8: memref<1x1x1x1xf32, #tpu.memory_space<vmem>>, %arg9: memref<2x256xf32, #tpu.memory_space<vmem>>) attributes {dimension_semantics = [#tpu.dimension_semantics<parallel>, #tpu.dimension_semantics<parallel>, #tpu.dimension_semantics<arbitrary>], iteration_bounds = array<i64: 1, 2, 1>, scalar_prefetch = 0 : i64, scratch_operands = 1 : i64, tpu.core_type = #tpu.core_type<tc>, window_params = [{transform_indices = @transform_0, window_bounds = array<i64: 1, 1, 256>}, {pipeline_mode = #tpu.pipeline_mode<synchronous>, transform_indices = @transform_1, window_bounds = array<i64: 5, 1>}, {transform_indices = @transform_2, window_bounds = array<i64: 1, 5, 256>}, {transform_indices = @transform_3, window_bounds = array<i64: 1, 5, 256>}, {transform_indices = @transform_4, window_bounds = array<i64: 1, 1, 1, 1>}, {transform_indices = @transform_5, window_bounds = array<i64: 1, 1, 1, 1>}]} {
    %c1_i32 = arith.constant 1 : i32
    %0 = arith.muli %arg0, %c1_i32 : i32
    %1 = arith.addi %0, %arg2 : i32
    %c0_i32 = arith.constant 0 : i32
    %2 = arith.cmpi eq, %arg2, %c0_i32 : i32
    %3 = arith.extui %2 : i1 to i32
    %c0_i32_0 = arith.constant 0 : i32
    %4 = arith.cmpi ne, %3, %c0_i32_0 : i32
    scf.if %4 {
      %cst_36 = arith.constant 0.000000e+00 : f32
      %80 = vector.broadcast %cst_36 : f32 to vector<2x256xf32>
      %c0_37 = arith.constant 0 : index
      %c0_38 = arith.constant 0 : index
      %81 = vector.load %arg9[%c0_37, %c0_38] : memref<2x256xf32, #tpu.memory_space<vmem>>, vector<2x256xf32>
      tpu.vector_store %arg9[%c0_37, %c0_38], %80 {strides = array<i32>} : memref<2x256xf32, #tpu.memory_space<vmem>>, vector<2x256xf32>,
    } else {
    }
    %c0 = arith.constant 0 : index
    %c0_1 = arith.constant 0 : index
    %5 = vector.load %arg4[%c0, %c0_1] : memref<5x1xf32, #tpu.memory_space<vmem>>, vector<5x1xf32>
    %c0_2 = arith.constant 0 : index
    %c0_3 = arith.constant 0 : index
    %c0_4 = arith.constant 0 : index
    %6 = vector.load %arg3[%c0_2, %c0_3, %c0_4] : memref<1x1x256xi32, #tpu.memory_space<vmem>>, vector<1x1x256xi32>
    %7 = vector.shape_cast %6 : vector<1x1x256xi32> to vector<1x256xi32>
    %8 = tpu.iota {dimensions = array<i32: 1>} : vector<1x256xi32>
    %c256_i32 = arith.constant 256 : i32
    %9 = arith.muli %1, %c256_i32 : i32
    %c0_i32_5 = arith.constant 0 : i32
    %10 = arith.addi %9, %c0_i32_5 : i32
    %11 = vector.broadcast %10 : i32 to vector<1x256xi32>
    %12 = arith.addi %11, %8 : vector<1x256xi32>
    %c256_i32_6 = arith.constant 256 : i32
    %13 = vector.broadcast %c256_i32_6 : i32 to vector<1x256xi32>
    %14 = arith.cmpi slt, %12, %13 : vector<1x256xi32>
    %c-1_i32 = arith.constant -1 : i32
    %15 = vector.broadcast %c-1_i32 : i32 to vector<1x256xi32>
    %16 = arith.cmpi ne, %7, %15 : vector<1x256xi32>
    %17 = arith.andi %14, %16 : vector<1x256xi1>
    %18 = tpu.iota {dimensions = array<i32: 0>} : vector<5x256xi32>
    %19 = vector.broadcast %7 : vector<1x256xi32> to vector<5x256xi32>
    %20 = arith.cmpi eq, %18, %19 : vector<5x256xi32>
    %cst = arith.constant 0.000000e+00 : f32
    %21 = vector.shape_cast %5 : vector<5x1xf32> to vector<5x1xf32>
    %22 = vector.broadcast %21 : vector<5x1xf32> to vector<5x256xf32>
    %23 = vector.broadcast %cst : f32 to vector<5x256xf32>
    %24 = arith.select %20, %22, %23 : vector<5x256xi1>, vector<5x256xf32>
    %cst_7 = arith.constant dense<0.000000e+00> : vector<256xf32>
    %25 = vector.multi_reduction <add>, %24, %cst_7 [0] : vector<5x256xf32> to vector<256xf32>
    %26 = vector.shape_cast %25 : vector<256xf32> to vector<1x256xf32>
    %cst_8 = arith.constant 0.000000e+00 : f32
    %27 = vector.broadcast %cst_8 : f32 to vector<1x256xf32>
    %c0_9 = arith.constant 0 : index
    %c0_10 = arith.constant 0 : index
    %c0_11 = arith.constant 0 : index
    %28 = vector.load %arg5[%c0_9, %c0_10, %c0_11] : memref<1x5x256xf32, #tpu.memory_space<vmem>>, vector<1x5x256xf32>
    %29 = vector.shape_cast %28 : vector<1x5x256xf32> to vector<5x256xf32>
    %cst_12 = arith.constant dense<0xFF800000> : vector<256xf32>
    %30 = vector.multi_reduction <maximumf>, %29, %cst_12 [0] : vector<5x256xf32> to vector<256xf32>
    %31 = vector.shape_cast %30 : vector<256xf32> to vector<1x256xf32>
    %32 = vector.broadcast %31 : vector<1x256xf32> to vector<5x256xf32>
    %33 = arith.subf %29, %32 : vector<5x256xf32>
    %34 = math.exp %33 : vector<5x256xf32>
    %cst_13 = arith.constant dense<0.000000e+00> : vector<256xf32>
    %35 = vector.multi_reduction <add>, %34, %cst_13 [0] : vector<5x256xf32> to vector<256xf32>
    %36 = vector.shape_cast %35 : vector<256xf32> to vector<1x256xf32>
    %37 = math.log %36 : vector<1x256xf32>
    %38 = arith.addf %31, %37 : vector<1x256xf32>
    %cst_14 = arith.constant 0.000000e+00 : f32
    %39 = vector.broadcast %cst_14 : f32 to vector<5x256xf32>
    %40 = arith.select %20, %29, %39 : vector<5x256xi1>, vector<5x256xf32>
    %cst_15 = arith.constant dense<0.000000e+00> : vector<256xf32>
    %41 = vector.multi_reduction <add>, %40, %cst_15 [0] : vector<5x256xf32> to vector<256xf32>
    %42 = vector.shape_cast %41 : vector<256xf32> to vector<1x256xf32>
    %43 = arith.subf %38, %42 : vector<1x256xf32>
    %cst_16 = arith.constant 1.000000e+00 : f32
    %44 = vector.broadcast %cst_16 : f32 to vector<1x256xf32>
    %45 = arith.mulf %44, %43 : vector<1x256xf32>
    %46 = arith.addf %27, %45 : vector<1x256xf32>
    %c0_17 = arith.constant 0 : index
    %c0_18 = arith.constant 0 : index
    %c0_19 = arith.constant 0 : index
    %47 = vector.load %arg6[%c0_17, %c0_18, %c0_19] : memref<1x5x256xf32, #tpu.memory_space<vmem>>, vector<1x5x256xf32>
    %48 = vector.shape_cast %47 : vector<1x5x256xf32> to vector<5x256xf32>
    %cst_20 = arith.constant dense<0xFF800000> : vector<256xf32>
    %49 = vector.multi_reduction <maximumf>, %48, %cst_20 [0] : vector<5x256xf32> to vector<256xf32>
    %50 = vector.shape_cast %49 : vector<256xf32> to vector<1x256xf32>
    %51 = vector.broadcast %50 : vector<1x256xf32> to vector<5x256xf32>
    %52 = arith.subf %48, %51 : vector<5x256xf32>
    %53 = math.exp %52 : vector<5x256xf32>
    %cst_21 = arith.constant dense<0.000000e+00> : vector<256xf32>
    %54 = vector.multi_reduction <add>, %53, %cst_21 [0] : vector<5x256xf32> to vector<256xf32>
    %55 = vector.shape_cast %54 : vector<256xf32> to vector<1x256xf32>
    %56 = math.log %55 : vector<1x256xf32>
    %57 = arith.addf %50, %56 : vector<1x256xf32>
    %cst_22 = arith.constant 0.000000e+00 : f32
    %58 = vector.broadcast %cst_22 : f32 to vector<5x256xf32>
    %59 = arith.select %20, %48, %58 : vector<5x256xi1>, vector<5x256xf32>
    %cst_23 = arith.constant dense<0.000000e+00> : vector<256xf32>
    %60 = vector.multi_reduction <add>, %59, %cst_23 [0] : vector<5x256xf32> to vector<256xf32>
    %61 = vector.shape_cast %60 : vector<256xf32> to vector<1x256xf32>
    %62 = arith.subf %57, %61 : vector<1x256xf32>
    %cst_24 = arith.constant 4.000000e-01 : f32
    %63 = vector.broadcast %cst_24 : f32 to vector<1x256xf32>
    %64 = arith.mulf %63, %62 : vector<1x256xf32>
    %65 = arith.addf %46, %64 : vector<1x256xf32>
    %c0_25 = arith.constant 0 : index
    %c0_26 = arith.constant 0 : index
    %66 = vector.load %arg9[%c0_25, %c0_26] : memref<2x256xf32, #tpu.memory_space<vmem>>, vector<1x256xf32>
    %67 = arith.mulf %65, %26 : vector<1x256xf32>
    %cst_27 = arith.constant 0.000000e+00 : f32
    %68 = vector.broadcast %cst_27 : f32 to vector<1x256xf32>
    %69 = arith.select %17, %67, %68 : vector<1x256xi1>, vector<1x256xf32>
    %70 = arith.addf %66, %69 : vector<1x256xf32>
    %c0_28 = arith.constant 0 : index
    %c0_29 = arith.constant 0 : index
    %71 = vector.load %arg9[%c0_28, %c0_29] : memref<2x256xf32, #tpu.memory_space<vmem>>, vector<1x256xf32>
    tpu.vector_store %arg9[%c0_28, %c0_29], %70 {strides = array<i32>} : memref<2x256xf32, #tpu.memory_space<vmem>>, vector<1x256xf32>,
    %c1 = arith.constant 1 : index
    %c0_30 = arith.constant 0 : index
    %72 = vector.load %arg9[%c1, %c0_30] : memref<2x256xf32, #tpu.memory_space<vmem>>, vector<1x256xf32>
    %cst_31 = arith.constant 0.000000e+00 : f32
    %73 = vector.broadcast %cst_31 : f32 to vector<1x256xf32>
    %74 = arith.select %17, %26, %73 : vector<1x256xi1>, vector<1x256xf32>
    %75 = arith.addf %72, %74 : vector<1x256xf32>
    %c1_32 = arith.constant 1 : index
    %c0_33 = arith.constant 0 : index
    %76 = vector.load %arg9[%c1_32, %c0_33] : memref<2x256xf32, #tpu.memory_space<vmem>>, vector<1x256xf32>
    tpu.vector_store %arg9[%c1_32, %c0_33], %75 {strides = array<i32>} : memref<2x256xf32, #tpu.memory_space<vmem>>, vector<1x256xf32>,
    %c0_i32_34 = arith.constant 0 : i32
    %77 = arith.cmpi eq, %arg2, %c0_i32_34 : i32
    %78 = arith.extui %77 : i1 to i32
    %c0_i32_35 = arith.constant 0 : i32
    %79 = arith.cmpi ne, %78, %c0_i32_35 : i32
    scf.if %79 {
      %c0_36 = arith.constant 0 : index
      %c0_37 = arith.constant 0 : index
      %80 = vector.load %arg9[%c0_36, %c0_37] : memref<2x256xf32, #tpu.memory_space<vmem>>, vector<1x256xf32>
      %cst_38 = arith.constant dense<0.000000e+00> : vector<1xf32>
      %81 = vector.multi_reduction <add>, %80, %cst_38 [1] : vector<1x256xf32> to vector<1xf32>
      %82 = vector.shape_cast %81 : vector<1xf32> to vector<1x1xf32>
      %c0_39 = arith.constant 0 : index
      %c0_40 = arith.constant 0 : index
      %c0_41 = arith.constant 0 : index
      %c0_42 = arith.constant 0 : index
      %83 = vector.load %arg7[%c0_39, %c0_40, %c0_41, %c0_42] : memref<1x1x1x1xf32, #tpu.memory_space<vmem>>, vector<1x1x1x1xf32>
      %84 = vector.shape_cast %83 : vector<1x1x1x1xf32> to vector<1x1xf32>
      %85 = vector.shape_cast %82 : vector<1x1xf32> to vector<1x1x1x1xf32>
      tpu.vector_store %arg7[%c0_39, %c0_40, %c0_41, %c0_42], %85 {strides = array<i32>} : memref<1x1x1x1xf32, #tpu.memory_space<vmem>>, vector<1x1x1x1xf32>,
      %c1_43 = arith.constant 1 : index
      %c0_44 = arith.constant 0 : index
      %86 = vector.load %arg9[%c1_43, %c0_44] : memref<2x256xf32, #tpu.memory_space<vmem>>, vector<1x256xf32>
      %cst_45 = arith.constant dense<0.000000e+00> : vector<1xf32>
      %87 = vector.multi_reduction <add>, %86, %cst_45 [1] : vector<1x256xf32> to vector<1xf32>
      %88 = vector.shape_cast %87 : vector<1xf32> to vector<1x1xf32>
      %c0_46 = arith.constant 0 : index
      %c0_47 = arith.constant 0 : index
      %c0_48 = arith.constant 0 : index
      %c0_49 = arith.constant 0 : index
      %89 = vector.load %arg8[%c0_46, %c0_47, %c0_48, %c0_49] : memref<1x1x1x1xf32, #tpu.memory_space<vmem>>, vector<1x1x1x1xf32>
      %90 = vector.shape_cast %89 : vector<1x1x1x1xf32> to vector<1x1xf32>
      %91 = vector.shape_cast %88 : vector<1x1xf32> to vector<1x1x1x1xf32>
      tpu.vector_store %arg8[%c0_46, %c0_47, %c0_48, %c0_49], %91 {strides = array<i32>} : memref<1x1x1x1xf32, #tpu.memory_space<vmem>>, vector<1x1x1x1xf32>,
    } else {
    }
    return
  }
  func.func @transform_0(%arg0: i32, %arg1: i32, %arg2: i32) -> (i32, i32, i32) {
    %c1_i32 = arith.constant 1 : i32
    %0 = arith.muli %arg0, %c1_i32 : i32
    %1 = arith.addi %0, %arg2 : i32
    %c0_i32 = arith.constant 0 : i32
    %2 = arith.minsi %1, %c0_i32 : i32
    %c0_i32_0 = arith.constant 0 : i32
    %c0_i32_1 = arith.constant 0 : i32
    return %arg1, %c0_i32_0, %2 : i32, i32, i32
  }
  func.func @transform_1(%arg0: i32, %arg1: i32, %arg2: i32) -> (i32, i32) {
    %c0_i32 = arith.constant 0 : i32
    %c0_i32_0 = arith.constant 0 : i32
    %c0_i32_1 = arith.constant 0 : i32
    return %c0_i32, %c0_i32_0 : i32, i32
  }
  func.func @transform_2(%arg0: i32, %arg1: i32, %arg2: i32) -> (i32, i32, i32) {
    %c1_i32 = arith.constant 1 : i32
    %0 = arith.muli %arg0, %c1_i32 : i32
    %1 = arith.addi %0, %arg2 : i32
    %c0_i32 = arith.constant 0 : i32
    %2 = arith.minsi %1, %c0_i32 : i32
    %c0_i32_0 = arith.constant 0 : i32
    %c0_i32_1 = arith.constant 0 : i32
    return %arg1, %c0_i32_0, %2 : i32, i32, i32
  }
  func.func @transform_3(%arg0: i32, %arg1: i32, %arg2: i32) -> (i32, i32, i32) {
    %c1_i32 = arith.constant 1 : i32
    %0 = arith.muli %arg0, %c1_i32 : i32
    %1 = arith.addi %0, %arg2 : i32
    %c0_i32 = arith.constant 0 : i32
    %2 = arith.minsi %1, %c0_i32 : i32
    %c0_i32_0 = arith.constant 0 : i32
    %c0_i32_1 = arith.constant 0 : i32
    return %arg1, %c0_i32_0, %2 : i32, i32, i32
  }
  func.func @transform_4(%arg0: i32, %arg1: i32, %arg2: i32) -> (i32, i32, i32, i32) {
    %c0_i32 = arith.constant 0 : i32
    %c0_i32_0 = arith.constant 0 : i32
    %c0_i32_1 = arith.constant 0 : i32
    return %arg0, %arg1, %c0_i32, %c0_i32_0 : i32, i32, i32, i32
  }
  func.func @transform_5(%arg0: i32, %arg1: i32, %arg2: i32) -> (i32, i32, i32, i32) {
    %c0_i32 = arith.constant 0 : i32
    %c0_i32_0 = arith.constant 0 : i32
    %c0_i32_1 = arith.constant 0 : i32
    return %arg0, %arg1, %c0_i32, %c0_i32_0 : i32, i32, i32, i32
  }
}

</mosaic_0001>

<bundles_post_ra>
// kernel: tpu_custom_call.1
= control target key start
LH: loop header
LB: loop body
LE: loop exit
PB: predicated region body
PF: predicated region fallthrough
CT: control target
= control target key end

     0   :  { %s919_s18 = smov 0   ;;  %s921_s19 = smov 0   ;;  %s1063_s0 = inlined_call_operand.vmem [shape: s32[2,1,256], index: 0, kind: input, shape index: {}]   ;;  %s1064_s1 = inlined_call_operand.vmem [shape: f32[5,1], index: 1, kind: input, shape index: {}]   ;;  %s1065_s2 = inlined_call_operand.vmem [shape: f32[2,5,256], index: 2, kind: input, shape index: {}]   ;;  %s1066_s3 = inlined_call_operand.vmem [shape: f32[2,5,256], index: 3, kind: input, shape index: {}]   ;;  %s1067_s4 = inlined_call_operand.vmem [shape: f32[1,2,1,1], index: 4, kind: output, shape index: {0}]   ;;  %s1068_s5 = inlined_call_operand.vmem [shape: f32[1,2,1,1], index: 5, kind: output, shape index: {1}]  }
   0x1   :  { %s923_s20 = smov 0  }
   0x2 LB: > { %s31_s21 = sadd.s32 1, %s881_s19  ;;  %p810_p0 = scmp.ge.s32.totalorder %s885_s20, 1  ;;  %s885_s20 = sphi %s923_s20, %s16_s20   ;;  %s881_s19 = sphi %s921_s19, %s1076_s19   ;;  %s877_s18 = sphi %s919_s18, %s1075_s18  }
   0x3   : > { %p33_p1 = scmp.ge.s32.totalorder %s31_s21, 2  ;;  %p289_p2 = scmp.lt.s32.totalorder %s885_s20, 3 }
   0x5   : > { %s1078_s21 = smov (%p33_p1, %s31_s21), 0  ;;  %p290_p3 = pnand %p810_p0, %p289_p2 }
   0x6   : > { %p360_p4 = scmp.lt.s32.totalorder (!%p290_p3), %s877_s18, 1 }
   0x7   : > { %293 = sbr.rel (%p290_p3) target bundleno = 281 (0x119), region = 36 }
   0xc   : > { %v423_v0 = vld [vmem:[%s1064_s1] sm:$0x1f]  ;;  %v887_v1 = vmov 0   ;;  %s1080_s18 = smov (!%p360_p4, %s877_s18), 1  ;;  %vm455_vm0 = vcmask 1044480   ;;  %v442_v50 = vlaneseq  ;;  %vm604_vm6 = vcmask 1040384  }
   0xd   : > { %846 = vset.pattern.permute.xlu0 %v887_v1  ;;  %s818_s24 = sshll.u32 %s1080_s18, 4  ;;  %s811_s6 = sshll.u32 %s1080_s18, 1  ;;  %vm638_vm8 = vcmask 0  }
   0xe   : > { %450 = vperm.xlu0 %846, %v423_v0   ;;  %s398_s27 = scalar_lea.vmem %s1066_s3, %s818_s24  ;;  %s382_s30 = scalar_lea.vmem %s1065_s2, %s818_s24  ;;  %v443_v57 = vshrl.u32 %v442_v50, 7  ;;  %vm610_vm7 = vcmp.lt.s32.totalorder %v442_v50, 256 }
   0xf   : > { %v950_v2 = vld [vmem:[%s398_s27] sm:$0x1f]  ;;  %v952_v3 = vld [vmem:[%s398_s27 + $0x8] sm:$0x1f]  ;;  %s366_s9 = scalar_lea.vmem %s1063_s0, %s811_s6  ;;  %s416_s12 = scalar_lea.vmem %s1068_s5, %s1080_s18 }
  0x10   : > { %v534_v4 = vsel %vm455_vm0, %v950_v2, -inf  ;;  %v541_v5 = vsel %vm455_vm0, %v952_v3, -inf  ;;  %v958_v6 = vld [vmem:[%s382_s30] sm:$0x1f]  ;;  %v960_v7 = vld [vmem:[%s382_s30 + $0x8] sm:$0x1f]  ;;  %s409_s15 = scalar_lea.vmem %s1067_s4, %s1080_s18 }
  0x11   : > { %v535_v8 = vrot.slane %v534_v4, 4  ;;  %v542_v9 = vrot.slane %v541_v5, 4  ;;  %v472_v10 = vsel %vm455_vm0, %v958_v6, -inf  ;;  %v479_v11 = vsel %vm455_vm0, %v960_v7, -inf  ;;  %v990_v53 = vld [vmem:[%s366_s9] sm:$0x3] }
  0x12   : > { %v473_v12 = vrot.slane %v472_v10, 4  ;;  %v480_v13 = vrot.slane %v479_v11, 4  ;;  %v444_v58 = vperm.slane %v990_v53, 0  ;;  %v445_v59 = vperm.slane %v990_v53, 1 }
  0x13   : > { %v536_v14 = vmax.f32 %v534_v4, %v535_v8  ;;  %v543_v15 = vmax.f32 %v541_v5, %v542_v9  ;;  %vm434_vm3 = vcmp.ne.s32.totalorder %v990_v53, 4294967295 }
  0x14   : > { %v474_v16 = vmax.f32 %v472_v10, %v473_v12  ;;  %v481_v17 = vmax.f32 %v479_v11, %v480_v13  ;;  %vm995_vm1 = vcmp.eq.s32.totalorder %v443_v57, %v444_v58  ;;  %vm999_vm2 = vcmp.eq.s32.totalorder %v443_v57, %v445_v59 }
  0x15   : > { %v537_v18 = vrot.slane %v536_v14, 2  ;;  %v544_v19 = vrot.slane %v543_v15, 2  ;;  %v574_v11 = vsel %vm995_vm1, %v950_v2, 0.0  ;;  %v575_v12 = vsel %vm999_vm2, %v952_v3, 0.0 }
  0x16   : > { %v475_v20 = vrot.slane %v474_v16, 2  ;;  %v482_v21 = vrot.slane %v481_v17, 2  ;;  %v435_v0 = vsel %vm434_vm3, 1, %v887_v1 }
  0x17   : > { %v538_v22 = vmax.f32 %v536_v14, %v537_v18  ;;  %v545_v23 = vmax.f32 %v543_v15, %v544_v19  ;;  %v512_v14 = vsel %vm995_vm1, %v958_v6, 0.0  ;;  %v583_v18 = vsel %vm455_vm0, %v575_v12, 0.0 }
  0x18   : > { %v476_v24 = vmax.f32 %v474_v16, %v475_v20  ;;  %v483_v25 = vmax.f32 %v481_v17, %v482_v21  ;;  %v513_v16 = vsel %vm999_vm2, %v960_v7, 0.0  ;;  %v576_v17 = vsel %vm455_vm0, %v574_v11, 0.0 }
  0x19   : > { %v539_v26 = vrot.slane %v538_v22, 1  ;;  %v546_v27 = vrot.slane %v545_v23, 1  ;;  %v514_v20 = vsel %vm455_vm0, %v512_v14, 0.0 }
  0x1a   : > { %v477_v28 = vrot.slane %v476_v24, 1  ;;  %v484_v29 = vrot.slane %v483_v25, 1 }
  0x1b   : > { %v966_v30 = vmax.f32 %v538_v22, %v539_v26  ;;  %v968_v31 = vmax.f32 %v545_v23, %v546_v27  ;;  %v577_v22 = vrot.slane %v576_v17, 4  ;;  %v584_v23 = vrot.slane %v583_v18, 4 }
  0x1c   : > { %v970_v32 = vmax.f32 %v476_v24, %v477_v28  ;;  %v972_v33 = vmax.f32 %v483_v25, %v484_v29  ;;  %v888_v24 = vmov 0.0   ;;  %v515_v26 = vrot.slane %v514_v20, 4 }
  0x1d   : > { %v548_v34 = vsub.f32 %v950_v2, %v966_v30  ;;  %v549_v35 = vsub.f32 %v952_v3, %v968_v31  ;;  %v521_v3 = vsel %vm455_vm0, %v513_v16, 0.0  ;;  %422 = vst [vmem:[#allocation2] sm:$0xf] %v888_v24  ;;  %v578_v29 = vadd.f32 %v577_v22, %v576_v17 }
  0x1e   : > { %v486_v36 = vsub.f32 %v958_v6, %v970_v32  ;;  %v487_v37 = vsub.f32 %v960_v7, %v972_v33  ;;  %v522_v7 = vrot.slane %v521_v3, 4  ;;  %v437_v22 = vperm.slane %v435_v0, 1 }
  0x1f   : > { %v550_v38 = vmul.f32 1.442695, %v548_v34  ;;  %v552_v39 = vmul.f32 1.442695, %v549_v35  ;;  %v585_v34 = vadd.f32 %v584_v23, %v583_v18 }
  0x20   : > { %v488_v40 = vmul.f32 1.442695, %v486_v36  ;;  %v490_v41 = vmul.f32 1.442695, %v487_v37  ;;  %v516_v37 = vadd.f32 %v515_v26, %v514_v20  ;;  %vm439_vm4 = vcmp.ne.s32.totalorder %v437_v22, 0 }
  0x21   : > { %847 = vpow2.f32 %v550_v38  ;;  %v523_v38 = vadd.f32 %v522_v7, %v521_v3 }
  0x22   : > { %849 = vpow2.f32 %v552_v39  ;;  %v579_v39 = vrot.slane %v578_v29, 2 }
  0x23   : > { %851 = vpow2.f32 %v488_v40  ;;  %v586_v40 = vrot.slane %v585_v34, 2 }
  0x24   : > { %853 = vpow2.f32 %v490_v41  ;;  %v517_v41 = vrot.slane %v516_v37, 2 }
  0x27   : > { %v848_v42 = vpop.eup %847 }
  0x28   : > { %v850_v43 = vpop.eup %849  ;;  %v554_v45 = vsel %vm455_vm0, %v848_v42, 0.0  ;;  %v524_v42 = vrot.slane %v523_v38, 2 }
  0x29   : > { %v852_v44 = vpop.eup %851  ;;  %v561_v47 = vsel %vm455_vm0, %v850_v43, 0.0  ;;  %v555_v49 = vrot.slane %v554_v45, 4 }
  0x2a   : > { %v854_v46 = vpop.eup %853  ;;  %v492_v48 = vsel %vm455_vm0, %v852_v44, 0.0  ;;  %v562_v52 = vrot.slane %v561_v47, 4  ;;  %v580_v44 = vadd.f32 %v579_v39, %v578_v29 }
  0x2b   : > { %v499_v51 = vsel %vm455_vm0, %v854_v46, 0.0  ;;  %v493_v54 = vrot.slane %v492_v48, 4  ;;  %v556_v56 = vadd.f32 %v555_v49, %v554_v45  ;;  %v587_v45 = vadd.f32 %v586_v40, %v585_v34 }
  0x2c   : > { %v500_v55 = vrot.slane %v499_v51, 4  ;;  %v563_v60 = vadd.f32 %v562_v52, %v561_v47  ;;  %v518_v47 = vadd.f32 %v517_v41, %v516_v37  ;;  %v525_v49 = vadd.f32 %v524_v42, %v523_v38  ;;  %v614_v37 = vld [vmem:[#allocation2 + $0x1] ss:$2 sm:$0x3] }
  0x2d   : > { %v494_v61 = vadd.f32 %v493_v54, %v492_v48  ;;  %v557_v63 = vrot.slane %v556_v56, 2  ;;  %v596_v41 = vld [vmem:[#allocation2] ss:$2 sm:$0x3] }
  0x2e   : > { %v501_v62 = vadd.f32 %v500_v55, %v499_v51  ;;  %v564_v5 = vrot.slane %v563_v60, 2  ;;  %v581_v55 = vrot.slane %v580_v44, 1  ;;  %v519_v58 = vrot.slane %v518_v47, 1 }
  0x2f   : > { %v495_v8 = vrot.slane %v494_v61, 2  ;;  %v558_v10 = vadd.f32 %v557_v63, %v556_v56  ;;  %v588_v56 = vrot.slane %v587_v45, 1 }
  0x30   : > { %v502_v9 = vrot.slane %v501_v62, 2  ;;  %v565_v13 = vadd.f32 %v564_v5, %v563_v60  ;;  %v526_v60 = vrot.slane %v525_v49, 1  ;;  %v582_v63 = vadd.f32 %v581_v55, %v580_v44 }
  0x31   : > { %v496_v15 = vadd.f32 %v495_v8, %v494_v61  ;;  %v559_v2 = vrot.slane %v558_v10, 1  ;;  %v589_v5 = vadd.f32 %v588_v56, %v587_v45  ;;  %v520_v12 = vadd.f32 %v519_v58, %v518_v47 }
  0x32   : > { %v503_v19 = vadd.f32 %v502_v9, %v501_v62  ;;  %v566_v21 = vrot.slane %v565_v13, 1  ;;  %v527_v14 = vadd.f32 %v526_v60, %v525_v49 }
  0x33   : > { %v497_v6 = vrot.slane %v496_v15, 1  ;;  %v560_v27 = vadd.f32 %v559_v2, %v558_v10 }
  0x34   : > { %v504_v25 = vrot.slane %v503_v19, 1  ;;  %v567_v28 = vadd.f32 %v566_v21, %v565_v13 }
  0x35   : > { %v498_v35 = vadd.f32 %v497_v6, %v496_v15  ;;  %855 = vlog2.f32 %v560_v27  ;;  %v436_v6 = vperm.slane %v435_v0, 0 }
  0x36   : > { %v505_v36 = vadd.f32 %v504_v25, %v503_v19  ;;  %857 = vlog2.f32 %v567_v28 }
  0x37   : > { %859 = vlog2.f32 %v498_v35  ;;  %vm1031_vm5 = vcmp.ne.s32.totalorder %v436_v6, 0 }
  0x38   : > { %861 = vlog2.f32 %v505_v36 }
  0x3b   : > { %v856_v43 = vpop.eup %855 }
  0x3c   : > { %v858_v46 = vpop.eup %857  ;;  %v569_v52 = vmul.f32 0.6931472, %v856_v43 }
  0x3d   : > { %v860_v48 = vpop.eup %859  ;;  %v571_v54 = vmul.f32 0.6931472, %v858_v46 }
  0x3e   : > { %v862_v51 = vpop.eup %861  ;;  %v507_v57 = vmul.f32 0.6931472, %v860_v48  ;;  %v572_v61 = vadd.f32 %v569_v52, %v966_v30 }
  0x3f   : > { %v509_v59 = vmul.f32 0.6931472, %v862_v51  ;;  %v573_v62 = vadd.f32 %v571_v54, %v968_v31 }
  0x40   : > { %v510_v11 = vadd.f32 %v507_v57, %v970_v32  ;;  %v590_v53 = vsub.f32 %v572_v61, %v582_v63 }
  0x41   : > { %v511_v31 = vadd.f32 %v509_v59, %v972_v33  ;;  %v591_v17 = vsub.f32 %v573_v62, %v589_v5 }
  0x42   : > { %v528_v4 = vsub.f32 %v510_v11, %v520_v12  ;;  %v592_v21 = vmul.f32 0.4, %v590_v53 }
  0x43   : > { %v529_v2 = vsub.f32 %v511_v31, %v527_v14  ;;  %v593_v3 = vmul.f32 0.4, %v591_v17 }
  0x44   : > { %v594_v26 = vadd.f32 %v592_v21, %v528_v4 }
  0x45   : > { %v595_v27 = vadd.f32 %v593_v3, %v529_v2 }
  0x80   : > { %v451_v8 = vpop.permute.xlu0 %450 }
  0x81   : > { %v453_v9 = vsel %vm995_vm1, %v451_v8, 0.0  ;;  %v454_v10 = vsel %vm999_vm2, %v451_v8, 0.0 }
  0x82   : > { %v456_v13 = vsel %vm455_vm0, %v453_v9, 0.0  ;;  %v463_v30 = vsel %vm455_vm0, %v454_v10, 0.0 }
  0x83   : > { %v457_v15 = vrot.slane %v456_v13, 4  ;;  %v464_v16 = vrot.slane %v463_v30, 4 }
  0x85   : > { %v458_v18 = vadd.f32 %v457_v15, %v456_v13  ;;  %v465_v19 = vadd.f32 %v464_v16, %v463_v30 }
  0x87   : > { %v459_v20 = vrot.slane %v458_v18, 2  ;;  %v466_v32 = vrot.slane %v465_v19, 2 }
  0x89   : > { %v460_v23 = vadd.f32 %v459_v20, %v458_v18  ;;  %v467_v24 = vadd.f32 %v466_v32, %v465_v19 }
  0x8b   : > { %v461_v33 = vrot.slane %v460_v23, 1  ;;  %v468_v25 = vrot.slane %v467_v24, 1 }
  0x8d   : > { %v462_v7 = vadd.f32 %v461_v33, %v460_v23  ;;  %v469_v28 = vadd.f32 %v468_v25, %v467_v24 }
  0x8f   : > { %v597_v29 = vmul.f32 %v594_v26, %v462_v7  ;;  %v598_v34 = vmul.f32 %v595_v27, %v469_v28  ;;  %v616_v35 = vsel %vm439_vm4, %v469_v28, 0.0  ;;  %v615_v39 = vsel %vm1031_vm5, %v462_v7, 0.0 }
  0x90   : > { %v619_v36 = vrot.slane %v616_v35, 7 }
  0x91   : > { %v600_v38 = vsel %vm439_vm4, %v598_v34, 0.0  ;;  %v599_v43 = vsel %vm1031_vm5, %v597_v29, 0.0 }
  0x92   : > { %v603_v40 = vrot.slane %v600_v38, 7  ;;  %v620_v42 = vsel %vm604_vm6, %v615_v39, %v619_v36 }
  0x93   : > { %v622_v44 = vadd.f32 %v620_v42, %v614_v37 }
  0x94   : > { %v605_v45 = vsel %vm604_vm6, %v599_v43, %v603_v40 }
  0x95   : > { %623 = vst.msk [vmem:[#allocation2 + $0x1] ss:$2 sm:$0x3] %vm610_vm7, %v622_v44  ;;  %v607_v46 = vadd.f32 %v605_v45, %v596_v41 }
  0x97   : > { %612 = vst.msk [vmem:[#allocation2] ss:$2 sm:$0x3] %vm610_vm7, %v607_v46 }
  0x9c   : > { %v640_v47 = vld [vmem:[#allocation2 + $0x1] ss:$2 sm:$0x3] }
  0x9d   : > { %v642_v48 = vperm.slane %v640_v47, 0  ;;  %v643_v49 = vperm.slane %v640_v47, 1 }
  0x9e   : > { %v627_v51 = vld [vmem:[#allocation2] ss:$2 sm:$0x3] }
  0x9f   : > { %v646_v50 = vsel %vm604_vm6, %v642_v48, 0.0  ;;  %v647_v52 = vsel %vm604_vm6, %v643_v49, 0.0  ;;  %v629_v54 = vperm.slane %v627_v51, 0  ;;  %v630_v55 = vperm.slane %v627_v51, 1 }
  0xa0   : > { %v648_v56 = vadd.f32 %v647_v52, %v646_v50 }
  0xa1   : > { %v633_v57 = vsel %vm604_vm6, %v629_v54, 0.0  ;;  %v634_v58 = vsel %vm604_vm6, %v630_v55, 0.0 }
  0xa2   : > { %649 = vadd.xlane.f32.xlu1 %v648_v56  ;;  %v635_v59 = vadd.f32 %v634_v58, %v633_v57 }
  0xa4   : > { %636 = vadd.xlane.f32.xlu0 %v635_v59 }
 0x115   : > { %v650_v60 = vpop.xlane.xlu1 %649 }
 0x116   : > { %651 = vst.msk [vmem:[%s416_s12] sm:$0x1] %vm638_vm8, %v650_v60 }
 0x117   : > { %v637_v61 = vpop.xlane.xlu0 %636 }
 0x118   : > { %639 = vst.msk [vmem:[%s409_s15] sm:$0x1] %vm638_vm8, %v637_v61 }
 0x119 PF: > { %s16_s20 = sadd.s32 1, %s885_s20   ;;  %s1075_s18 = smov %s881_s19 }
 0x11a   : > { %p13_p5 = scmp.ge.s32.totalorder %s16_s20, 4   ;;  %s1076_s19 = smov %s1078_s21 }
 0x11c   :  { %15 = sbr.rel (!%p13_p5) target bundleno = 2 (0x2), region = 93 }

</bundles_post_ra>
